<compile_context>
chip_gen: v7x
topology: tpu7x:2x2x1
jax: 0.10.0
libtpu: 0.0.40
codegen_flags: <defaults>
</compile_context>

<pallas_src>
import jax
import jax.numpy as jnp
from jax.experimental import pallas as pl
from jax.experimental.pallas import tpu as pltpu


def _round_up(x: int, m: int) -> int:
    return ((x + m - 1) // m) * m


def _linear_kernel(x_ref, w_ref, b_ref, o_ref):
    # x_ref: (TM, K), w_ref: (K, N), b_ref: (1, N) f32, o_ref: (TM, N)
    acc = jnp.dot(x_ref[...], w_ref[...], preferred_element_type=jnp.float32)
    o_ref[...] = (acc + b_ref[...]).astype(o_ref.dtype)


def projector_f(x, w_t, b, *, block_rows=None, compute_dtype=None,
                out_dtype=None, xla_fallback_rows=512):
    """nn.Linear forward: y = x @ w_t + b.

    x:   (..., input_dim)
    w_t: (input_dim, embed_dim)   # torch weight.T
    b:   (embed_dim,)

    block_rows:        rows-per-tile (auto-sized to a VMEM budget if None)
    compute_dtype:     e.g. jnp.bfloat16 for the matmul inputs (f32 accumulate).
                       NOTE: this only trims the small x/W reads; the (M, N)
                       output write dominates HBM traffic for K << N.
    out_dtype:         output dtype (defaults to x.dtype).  Passing
                       jnp.bfloat16 halves the dominant output write and is the
                       biggest bandwidth lever when downstream tolerates it.
    xla_fallback_rows: if flattened M <= this, skip Pallas (launch / per-step
                       overhead dwarfs tiny matmuls) and let XLA fuse it.
    """
    *lead, k = x.shape
    kw, n = w_t.shape
    assert kw == k, f"weight/input mismatch: {kw} vs {k}"
    out_dtype = out_dtype or x.dtype

    x2 = x.reshape(-1, k)
    m = x2.shape[0]

    # Tiny-problem dispatch: plain XLA is strictly faster below the Pallas
    # launch/per-step overhead floor.
    if m <= xla_fallback_rows:
        cd = compute_dtype or x2.dtype
        y = jnp.dot(x2.astype(cd), w_t.astype(cd),
                    preferred_element_type=jnp.float32)
        y = y + b.astype(jnp.float32)
        return y.astype(out_dtype).reshape(*lead, n)

    if compute_dtype is not None:
        x2 = x2.astype(compute_dtype)
        w_t = w_t.astype(compute_dtype)
    b2 = b.reshape(1, n).astype(jnp.float32)  # f32 epilogue on every generation

    in_itemsize = jnp.dtype(x2.dtype).itemsize
    w_itemsize = jnp.dtype(w_t.dtype).itemsize
    out_itemsize = jnp.dtype(out_dtype).itemsize

    # VMEM bytes per streamed row: the lane (last) dim is padded to a multiple
    # of 128 elements in VMEM (K=32 -> 128), the sublane dim is already a
    # multiple of 8 because tm is.  Factor 2 = double buffering of x and y.
    padded_k = _round_up(k, 128)
    padded_n = _round_up(n, 128)
    per_row = 2 * (padded_k * in_itemsize + padded_n * out_itemsize)

    if block_rows is None:
        # ~24 MiB of double-buffered streamed tiles: big enough to amortize the
        # ~0.35 us per-grid-step overhead on v6e/v7x, comfortably inside v7x's
        # 64 MiB physical VMEM (v5e/v6e have 128 MiB; we raise the scoped limit
        # explicitly below so the 16/32 MiB defaults don't bind).
        budget = 24 * 1024 * 1024
        block_rows = max(8, min(8192, budget // max(per_row, 1)))
        if m > 1024:
            # Guarantee >= 2 grid steps so dimension_semantics=("parallel",)
            # actually splits rows across v7x's two TensorCores.
            block_rows = min(block_rows, _round_up(pl.cdiv(m, 2), 8))
    block_rows = max(8, (block_rows // 8) * 8)

    tm = min(_round_up(m, 8), block_rows)
    # Ragged last block: no jnp.pad / out[:m] copies.  OOB rows of the boundary
    # x tile are undefined but their result rows are masked on write-back.
    grid = (pl.cdiv(m, tm),)

    # Resident weight/bias are tiny (K=32, N=256 -> <70 KiB double-buffered), so
    # we skip pipeline_mode=pl.Buffered(1); the headroom win would be noise.
    resident = 2 * (_round_up(k, 16) * padded_n * w_itemsize
                    + 8 * padded_n * 4)
    vmem_needed = tm * per_row + resident
    vmem_limit = int(min(max(vmem_needed * 3 // 2, 16 * 1024 * 1024),
                         64 * 1024 * 1024))

    cost = pl.CostEstimate(
        flops=2 * m * k * n,
        transcendentals=0,
        bytes_accessed=(m * k * in_itemsize + k * n * w_itemsize
                        + n * 4 + m * n * out_itemsize),
    )

    # TODO(synk): if input_dim grows into the thousands, add an innermost
    # "arbitrary" K grid axis with an f32 VMEM accumulator; at small K the
    # single-K-block form below is optimal.
    out = pl.pallas_call(
        _linear_kernel,
        out_shape=jax.ShapeDtypeStruct((m, n), out_dtype),
        grid=grid,
        in_specs=[
            pl.BlockSpec((tm, k), lambda i: (i, 0)),   # streamed per tile
            pl.BlockSpec((k, n), lambda i: (0, 0)),    # resident weight
            pl.BlockSpec((1, n), lambda i: (0, 0)),    # resident bias
        ],
        out_specs=pl.BlockSpec((tm, n), lambda i: (i, 0)),
        compiler_params=pltpu.CompilerParams(
            dimension_semantics=("parallel",),          # megacore on v7x
            vmem_limit_bytes=vmem_limit,
        ),
        cost_estimate=cost,
    )(x2, w_t, b2)

    return out.reshape(*lead, n)


def init_projector_params(key, input_dim, embed_dim=256, dtype=jnp.float32):
    """Deterministic synthetic init matching nn.Linear's parameter shapes."""
    kw, kb = jax.random.split(key)
    bound = 1.0 / (input_dim ** 0.5)  # torch default fan-in scale
    # torch weight shape is (embed_dim, input_dim); we store its transpose.
    w_t = jax.random.uniform(kw, (input_dim, embed_dim), dtype, -bound, bound)
    b = jax.random.uniform(kb, (embed_dim,), dtype, -bound, bound)
    return w_t, b


if __name__ == "__main__":
    key = jax.random.PRNGKey(0)
    k_x, k_p, k_big, k_mega = jax.random.split(key, 4)

    batch, seq, input_dim, embed_dim = 2, 8, 32, 256
    x = jax.random.normal(k_x, (batch, seq, input_dim), jnp.float32)
    w_t, b = init_projector_params(k_p, input_dim, embed_dim)
    y_ref = x @ w_t + b

    # --- tiny M: default path falls back to XLA (launch overhead dominates) ---
    y_small = projector_f(x, w_t, b)
    jax.block_until_ready(y_small)
    assert y_small.shape == (batch, seq, embed_dim)
    assert jnp.allclose(y_small, y_ref, atol=1e-5, rtol=1e-5)

    # --- same inputs forced through the Pallas kernel (single tile) ---
    y_pl = projector_f(x, w_t, b, xla_fallback_rows=0)
    jax.block_until_ready(y_pl)
    assert jnp.allclose(y_pl, y_ref, atol=1e-5, rtol=1e-5)

    # --- ragged M (not a multiple of the tile): cdiv grid, no pad / no slice ---
    m_big = 1003
    x_big = jax.random.normal(k_big, (m_big, input_dim), jnp.float32)
    y_big = projector_f(x_big, w_t, b, block_rows=256)
    jax.block_until_ready(y_big)
    y_big_ref = x_big @ w_t + b
    assert y_big.shape == (m_big, embed_dim)
    assert jnp.allclose(y_big, y_big_ref, atol=1e-5, rtol=1e-5)

    # --- M > 1024 with auto tiling: >= 2 grid steps (v7x megacore engages);
    #     bf16 output halves the dominant (M, 256) write. ---
    m_mega = 2048
    x_mega = jax.random.normal(k_mega, (m_mega, input_dim), jnp.float32)
    y_mega = projector_f(x_mega, w_t, b, compute_dtype=jnp.bfloat16,
                         out_dtype=jnp.bfloat16)
    jax.block_until_ready(y_mega)
    y_mega_ref = x_mega @ w_t + b
    assert y_mega.shape == (m_mega, embed_dim)
    assert jnp.allclose(y_mega.astype(jnp.float32), y_mega_ref,
                        atol=1e-1, rtol=1e-1)

    print("KERNEL_OK")
</pallas_src>

<mosaic_0001>
module attributes {stable_mosaic.version = 11 : i64} {
  func.func @_linear_kernel(%arg0: i32, %arg1: memref<16x32xf32, #tpu.memory_space<vmem>>, %arg2: memref<32x256xf32, #tpu.memory_space<vmem>>, %arg3: memref<1x256xf32, #tpu.memory_space<vmem>>, %arg4: memref<16x256xf32, #tpu.memory_space<vmem>>) attributes {dimension_semantics = [#tpu.dimension_semantics<parallel>], iteration_bounds = array<i64: 1>, scalar_prefetch = 0 : i64, scratch_operands = 0 : i64, tpu.core_type = #tpu.core_type<tc>, window_params = [{transform_indices = @transform_0, window_bounds = array<i64: 16, 32>}, {pipeline_mode = #tpu.pipeline_mode<synchronous>, transform_indices = @transform_1, window_bounds = array<i64: 32, 256>}, {pipeline_mode = #tpu.pipeline_mode<synchronous>, transform_indices = @transform_2, window_bounds = array<i64: 1, 256>}, {transform_indices = @transform_3, window_bounds = array<i64: 16, 256>}]} {
    %c0 = arith.constant 0 : index
    %c0_0 = arith.constant 0 : index
    %0 = vector.load %arg1[%c0, %c0_0] : memref<16x32xf32, #tpu.memory_space<vmem>>, vector<16x32xf32>
    %c0_1 = arith.constant 0 : index
    %c0_2 = arith.constant 0 : index
    %1 = vector.load %arg2[%c0_1, %c0_2] : memref<32x256xf32, #tpu.memory_space<vmem>>, vector<32x256xf32>
    %cst = arith.constant dense<0.000000e+00> : vector<16x256xf32>
    %2 = tpu.matmul %0, %1, %cst {dimension_numbers = #tpu.dot_dimension_numbers<[1], [0], [0], [1], [0, 0, 1, 1], [], []>} : vector<16x32xf32>, vector<32x256xf32>, vector<16x256xf32> -> vector<16x256xf32>
    %c0_3 = arith.constant 0 : index
    %c0_4 = arith.constant 0 : index
    %3 = vector.load %arg3[%c0_3, %c0_4] : memref<1x256xf32, #tpu.memory_space<vmem>>, vector<1x256xf32>
    %4 = vector.broadcast %3 : vector<1x256xf32> to vector<16x256xf32>
    %5 = arith.addf %2, %4 : vector<16x256xf32>
    %c0_5 = arith.constant 0 : index
    %c0_6 = arith.constant 0 : index
    %6 = vector.load %arg4[%c0_5, %c0_6] : memref<16x256xf32, #tpu.memory_space<vmem>>, vector<16x256xf32>
    tpu.vector_store %arg4[%c0_5, %c0_6], %5 {strides = array<i32>} : memref<16x256xf32, #tpu.memory_space<vmem>>, vector<16x256xf32>,
    return
  }
  func.func @transform_0(%arg0: i32) -> (i32, i32) {
    %c0_i32 = arith.constant 0 : i32
    %c0_i32_0 = arith.constant 0 : i32
    return %arg0, %c0_i32 : i32, i32
  }
  func.func @transform_1(%arg0: i32) -> (i32, i32) {
    %c0_i32 = arith.constant 0 : i32
    %c0_i32_0 = arith.constant 0 : i32
    %c0_i32_1 = arith.constant 0 : i32
    return %c0_i32, %c0_i32_0 : i32, i32
  }
  func.func @transform_2(%arg0: i32) -> (i32, i32) {
    %c0_i32 = arith.constant 0 : i32
    %c0_i32_0 = arith.constant 0 : i32
    %c0_i32_1 = arith.constant 0 : i32
    return %c0_i32, %c0_i32_0 : i32, i32
  }
  func.func @transform_3(%arg0: i32) -> (i32, i32) {
    %c0_i32 = arith.constant 0 : i32
    %c0_i32_0 = arith.constant 0 : i32
    return %arg0, %c0_i32 : i32, i32
  }
}

</mosaic_0001>

<bundles_post_ra>
// kernel: tpu_custom_call.1
= control target key start
LH: loop header
LB: loop body
LE: loop exit
PB: predicated region body
PF: predicated region fallthrough
CT: control target
= control target key end

     0   :  { %8 = vsyncpa [#allocation3], 0  ;;  %s338_s0 = inlined_call_operand.hbm [shape: f32[16,32], index: 0, kind: input, shape index: {}]   ;;  %s339_s1 = inlined_call_operand.hbm [shape: f32[32,256], index: 1, kind: input, shape index: {}]   ;;  %s340_s2 = inlined_call_operand.vmem [shape: f32[1,256], index: 2, kind: input, shape index: {}]   ;;  %s341_s3 = inlined_call_operand.hbm [shape: f32[16,256], index: 3, kind: output, shape index: {}]  }
   0x1   :  { %9 = vsyncpa [#allocation6], 0 }
   0x2   :  { %10 = vsyncpa [#allocation4], 0  ;;  %s265_s12 = smov [#allocation2]   ;;  %s193_s16 = scalar_lea.hbm %s338_s0, 256 }
   0x3   :  { %s16_s13 = sshll.u32 %s265_s12, 4  ;;  %p194_p0 = scmp.ne.s32.totalorder %s338_s0, %s193_s16  ;;  %s17_s13 = int_to_ptr.vmem [resolvable:$true] %s16_s13 }
   0x4   :  { %p197_p1 = scmp.lt.u32.totalorder %s193_s16, %s338_s0 }
   0x6   :  { %p199_p2 = pnand %p197_p1, %p194_p0 }
   0x8   :  { %202 = shalt.err (!%p199_p2)
}
   0x9   :  { %s203_s21 = scalar_lea.vmem %s17_s13, 256  ;;  %p208_p4 = scmp.lt.s32.totalorder %s17_s13, %s17_s13 }
   0xa   :  { %p204_p3 = scmp.ne.s32.totalorder %s17_s13, %s203_s21  ;;  %p209_p5 = scmp.lt.s32.totalorder %s203_s21, %s203_s21 }
   0xc   :  { %p210_p6 = por %p209_p5, %p208_p4 }
   0xe   :  { %p211_p7 = pnand %p210_p6, %p204_p3 }
  0x10   :  { %214 = shalt.err (!%p211_p7)
}
  0x11   :  { %s266_s22 = smov 128   ;;  %s267_s23 = smov 8  }
  0x12   :  { %22 = dma.hbm_to_vmem [thread:$0]  %s338_s0, 256, %s17_s13, [#allocation3], %s266_s22, %s266_s22, %s267_s23  }
  0x13   :  { %s268_s26 = smov [#allocation5]   ;;  %s215_s30 = scalar_lea.hbm %s339_s1, 1024 }
  0x14   :  { %s28_s27 = sshll.u32 %s268_s26, 4  ;;  %p216_p8 = scmp.ne.s32.totalorder %s339_s1, %s215_s30  ;;  %s29_s27 = int_to_ptr.vmem [resolvable:$true] %s28_s27 }
  0x15   :  { %p219_p9 = scmp.lt.u32.totalorder %s215_s30, %s339_s1 }
  0x17   :  { %p221_p10 = pnand %p219_p9, %p216_p8 }
  0x19   :  { %224 = shalt.err (!%p221_p10)
}
  0x1a   :  { %s225_s8 = scalar_lea.vmem %s29_s27, 1024  ;;  %p230_p12 = scmp.lt.s32.totalorder %s29_s27, %s29_s27 }
  0x1b   :  { %p226_p11 = scmp.ne.s32.totalorder %s29_s27, %s225_s8  ;;  %p231_p13 = scmp.lt.s32.totalorder %s225_s8, %s225_s8 }
  0x1d   :  { %p232_p0 = por %p231_p13, %p230_p12 }
  0x1f   :  { %p233_p1 = pnand %p232_p0, %p226_p11 }
  0x21   :  { %236 = shalt.err (!%p233_p1)
}
  0x22   :  { %s269_s0 = smov 256   ;;  %s270_s9 = smov 16  }
  0x23   :  { %34 = dma.hbm_to_vmem [thread:$0]  %s339_s1, 1024, %s29_s27, [#allocation6], %s269_s0, %s269_s0, %s270_s9  }
  0x24   :  { %259 = dma.done.wait [#allocation3], 256  }
  0x25   :  { %260 = vsyncadd [#allocation3], 4294967040 }
  0x26   :  { %261 = dma.done.wait [#allocation6], 1024  }
  0x27   :  { %262 = vsyncadd [#allocation6], 4294966272  ;;  %v271_v0 = vmov 0.0   ;;  %v46_v1 = vld [vmem:[#allocation5 + $0x8] sm:$0xff]  ;;  %v48_v2 = vld [vmem:[#allocation5 + $0x18] sm:$0xff]  ;;  %vm65_vm0 = vcmask 261120   ;;  %v55_v15 = vlaneseq }
  0x28   :  { %136 = vmatprep.mubr.f32.mxu0 %v271_v0  ;;  %142 = vmatprep.mubr.f32.mxu1 %v271_v0  ;;  %v45_v3 = vld [vmem:[#allocation5] sm:$0xff]  ;;  %v173_v4 = vpack.c.bf16 %v48_v2, %v46_v1  ;;  %v47_v5 = vld [vmem:[#allocation5 + $0x10] sm:$0xff]  ;;  %v50_v6 = vld [vmem:[#allocation5 + $0x28] sm:$0xff]  ;;  %s272_s13 = smov [#allocation7]  }
  0x29   :  { %v52_v7 = vld [vmem:[#allocation5 + $0x38] sm:$0xff]  ;;  %v175_v8 = vpack.c.bf16 %v47_v5, %v45_v3  ;;  %v49_v10 = vld [vmem:[#allocation5 + $0x20] sm:$0xff]  ;;  %v51_v11 = vld [vmem:[#allocation5 + $0x30] sm:$0xff]  ;;  %v56_v16 = vshrl.u32 %v55_v15, 7  ;;  %s158_s14 = sshll.u32 %s272_s13, 4  ;;  %s159_s14 = int_to_ptr.vmem [resolvable:$true] %s158_s14 }
  0x2a   :  { %v177_v9 = vpack.c.bf16 %v52_v7, %v50_v6  ;;  %174 = vmatprep.subr.bf16.mxu0 %v173_v4  ;;  %181 = vmatprep.subr.bf16.mxu1 %v173_v4  ;;  %v179_v12 = vpack.c.bf16 %v51_v11, %v49_v10  ;;  %v43_v13 = vld [vmem:[#allocation2] sm:$0xff]  ;;  %v44_v14 = vld [vmem:[#allocation2 + $0x8] sm:$0xff]  ;;  %s237_s15 = scalar_lea.vmem %s159_s14, 512  ;;  %p242_p3 = scmp.lt.s32.totalorder %s159_s14, %s159_s14 }
  0x2b   :  { %176 = vmatpush1.bf16.msra.mxu0 %v175_v8  ;;  %183 = vmatpush1.bf16.msra.mxu1 %v175_v8  ;;  %v57_v17 = vsub.s32 0, %v56_v16  ;;  %v53_v18 = vld [vmem:[%s340_s2] sm:$0x3]  ;;  %v61_v19 = vsub.s32 1, %v56_v16  ;;  %p238_p2 = scmp.ne.s32.totalorder %s159_s14, %s237_s15  ;;  %p243_p4 = scmp.lt.s32.totalorder %s237_s15, %s237_s15 }
  0x2c   :  { %178 = vmatprep.subr.bf16.mxu0 %v177_v9  ;;  %182 = vmatprep.subr.bf16.mxu1 %v177_v9 }
  0x2d   :  { %v58_v20 = vrot.slane %v53_v18, %v57_v17  ;;  %v62_v21 = vrot.slane %v53_v18, %v61_v19  ;;  %p244_p5 = por %p243_p4, %p242_p3 }
  0x2f   :  { %180 = vmatpush1.bf16.msra.mxu0 %v179_v12  ;;  %184 = vmatpush1.bf16.msra.mxu1 %v179_v12  ;;  %p245_p6 = pnand %p244_p5, %p238_p2 }
  0x32   :  { %171 = vmatmul.mubr.msk.f32.vlgmr.msra.gmra.mrb[0].mxu0 %vm65_vm0, %v43_v13  ;;  %172 = vmatmul.mubr.msk.f32.vlgmr.msra.gmra.mrb[0].mxu1 %vm65_vm0, %v44_v14 }
 0x105   :  { %v138_v22 = vpop.f32.mrb[0].mxu0  ;;  %v144_v23 = vpop.f32.mrb[0].mxu1 }
 0x106   :  { %v139_v24 = vadd.f32 %v138_v22, %v58_v20  ;;  %v145_v25 = vadd.f32 %v144_v23, %v58_v20  ;;  %v140_v26 = vpop.f32.mrb[1].mxu0  ;;  %v146_v27 = vpop.f32.mrb[1].mxu1 }
 0x107   :  { %v141_v28 = vadd.f32 %v140_v26, %v62_v21  ;;  %v147_v29 = vadd.f32 %v146_v27, %v62_v21 }
 0x108   :  { %149 = vst [vmem:[#allocation7] sm:$0xff] %v139_v24  ;;  %151 = vst [vmem:[#allocation7 + $0x10] sm:$0xff] %v145_v25 }
 0x109   :  { %150 = vst [vmem:[#allocation7 + $0x8] sm:$0xff] %v141_v28  ;;  %152 = vst [vmem:[#allocation7 + $0x18] sm:$0xff] %v147_v29 }
 0x10a   :  { %248 = shalt.err (!%p245_p6)
}
 0x10b   :  { %s249_s17 = scalar_lea.hbm %s341_s3, 512 }
 0x10c   :  { %p250_p7 = scmp.ne.s32.totalorder %s341_s3, %s249_s17  ;;  %p253_p8 = scmp.lt.u32.totalorder %s249_s17, %s341_s3 }
 0x10e   :  { %p255_p9 = pnand %p253_p8, %p250_p7 }
 0x110   :  { %258 = shalt.err (!%p255_p9)
}
 0x111   :  { %164 = dma.vmem_to_hbm [thread:$0]  %s159_s14, 512, %s341_s3, [#allocation4], %s269_s0, %s269_s0, %s270_s9  }
 0x112   :  { %263 = dma.done.wait [#allocation4], 512  }
 0x113   :  { %264 = vsyncadd [#allocation4], 4294966784 }
 0x114   :  { %168 = vsyncpa [#allocation3], 1 }
 0x115   :  { %169 = vsyncpa [#allocation6], 1 }
 0x116   :  { %170 = vsyncpa [#allocation4], 1 }

</bundles_post_ra>
